<compile_context>
chip_gen: v7x
topology: tpu7x:2x2x1
jax: 0.10.0
libtpu: 0.0.40
codegen_flags: <defaults>
</compile_context>

<pallas_src>
import functools
import math

import jax
import jax.numpy as jnp
from jax.experimental import pallas as pl
from jax.experimental.pallas import tpu as pltpu


# ---------------------------------------------------------------------------
# Fused kernel: cos_theta tile + curricular transform + target scatter + *s
# ---------------------------------------------------------------------------
def _curricular_fused_kernel(t_ref, lbl_ref, ctm_ref, ftl_ref,
                             x_ref, w_ref, invw_ref, out_ref, *, s):
    j = pl.program_id(1)
    t = t_ref[0, 0]                                          # scalar EMA param (SMEM)

    # bf16 x bf16 -> f32 accumulate on the MXU; post-scale by 1/||w_col||.
    ct = jnp.dot(x_ref[...], w_ref[...], preferred_element_type=jnp.float32)
    ct = jnp.clip(ct * invw_ref[...], -1.0, 1.0)             # (tm, tn)

    ctm = ctm_ref[...]                                        # (tm, 1) f32
    out = jnp.where(ct > ctm, ct * (t + ct), ct)              # hard-example reweight

    tm, tn = out.shape
    col = jax.lax.broadcasted_iota(jnp.int32, (tm, tn), 1) + j * tn
    out = jnp.where(col == lbl_ref[...], ftl_ref[...], out)   # scatter final target logit

    out_ref[...] = (out * s).astype(out_ref.dtype)


# ---------------------------------------------------------------------------
# Wrapper
# ---------------------------------------------------------------------------
def _pick_block(dim, cap, quantum):
    """Largest block <= cap that divides dim and is a multiple of `quantum`,
    falling back to the full dim (full-extent blocks are always legal).
    NOTE: for prime-ish dims > cap this falls back to a single full-dim tile;
    pad N/C upstream if that would blow the VMEM limit."""
    if dim <= cap:
        return dim
    blk = (cap // quantum) * quantum
    while blk >= quantum:
        if dim % blk == 0:
            return blk
        blk -= quantum
    return dim


def curricular_face(embeddings, weight, labels, t, *, margin=0.5, s=64.0,
                    block_n=256, block_c=1024, mxu_dtype=jnp.bfloat16,
                    vmem_limit_bytes=48 * 1024 * 1024):
    """CurricularFace forward.

    embeddings: (N, D) float
    weight:     (D, C) float (the module's `kernel` Parameter)
    labels:     (N,)   int class indices
    t:          scalar f32, the module's EMA buffer
    Returns (output (N, C) f32, t_new scalar f32).
    """
    n, d = embeddings.shape
    d2, c = weight.shape
    assert d == d2

    # ---- f32 pre-step (O(N*D) + O(C)): normalization scales, target logit, margin terms
    emb32 = embeddings.astype(jnp.float32)
    w32 = weight.astype(jnp.float32)
    emb_n = emb32 * jax.lax.rsqrt(jnp.sum(emb32 * emb32, axis=1, keepdims=True))   # (N, D)
    inv_wn = jax.lax.rsqrt(jnp.sum(w32 * w32, axis=0, keepdims=True))              # (1, C)

    lbl = labels.astype(jnp.int32)
    w_cols = jnp.take(w32, lbl, axis=1).T                                          # (N, D)
    inv_cols = jnp.take(inv_wn[0], lbl)                                            # (N,)
    tl = jnp.clip(jnp.sum(emb_n * w_cols, axis=1) * inv_cols, -1.0, 1.0)[:, None]  # (N, 1)

    cos_m = math.cos(margin)
    sin_m = math.sin(margin)
    threshold = math.cos(math.pi - margin)
    sin_mm = math.sin(math.pi - margin) * margin

    sin_theta = jnp.sqrt(jnp.maximum(1.0 - tl * tl, 0.0))
    cos_theta_m = tl * cos_m - sin_theta * sin_m                                    # (N, 1)
    ftl = jnp.where(tl > threshold, cos_theta_m, tl - sin_mm)                       # (N, 1)
    t_new = (jnp.float32(0.01) * jnp.mean(tl)
             + jnp.float32(0.99) * jnp.asarray(t, jnp.float32))

    # ---- MXU operands (cast once, in the wrapper) -------------------------------
    emb_mxu = emb_n.astype(mxu_dtype)
    w_mxu = weight.astype(mxu_dtype)
    lbl2d = lbl.reshape(n, 1)

    tm = _pick_block(n, block_n, 16)     # sublane tile (16-quantum for bf16 packing)
    tn = _pick_block(c, block_c, 128)    # lane-aligned class tile
    grid = (n // tm, c // tn)

    kernel = functools.partial(_curricular_fused_kernel, s=float(s))

    out = pl.pallas_call(
        kernel,
        grid=grid,
        in_specs=[
            pl.BlockSpec(memory_space=pltpu.MemorySpace.SMEM),   # t_new (1, 1) scalar
            pl.BlockSpec((tm, 1), lambda i, j: (i, 0)),           # labels
            pl.BlockSpec((tm, 1), lambda i, j: (i, 0)),           # cos_theta_m
            pl.BlockSpec((tm, 1), lambda i, j: (i, 0)),           # final target logit
            pl.BlockSpec((tm, d), lambda i, j: (i, 0)),           # normalized embeddings (bf16)
            pl.BlockSpec((d, tn), lambda i, j: (0, j)),           # raw weight (bf16)
            pl.BlockSpec((1, tn), lambda i, j: (0, j)),           # 1/||w_col|| (f32)
        ],
        out_specs=pl.BlockSpec((tm, tn), lambda i, j: (i, j)),
        out_shape=jax.ShapeDtypeStruct((n, c), jnp.float32),
        compiler_params=pltpu.CompilerParams(
            dimension_semantics=("parallel", "parallel"),
            vmem_limit_bytes=vmem_limit_bytes),
    )(t_new.reshape(1, 1), lbl2d, cos_theta_m, ftl, emb_mxu, w_mxu, inv_wn)

    return out, t_new


# ---------------------------------------------------------------------------
# References
# ---------------------------------------------------------------------------
def curricular_face_ref(embeddings, weight, labels, t, *, margin=0.5, s=64.0):
    """Strict f32 mirror of CurricularFace.forward."""
    emb = embeddings.astype(jnp.float32)
    w = weight.astype(jnp.float32)
    emb_n = emb / jnp.linalg.norm(emb, ord=2, axis=1, keepdims=True)
    w_n = w / jnp.linalg.norm(w, ord=2, axis=0, keepdims=True)
    cos_theta = jnp.clip(
        jnp.matmul(emb_n, w_n, precision=jax.lax.Precision.HIGHEST), -1.0, 1.0)
    n = emb.shape[0]
    tl = cos_theta[jnp.arange(n), labels][:, None]
    sin_theta = jnp.sqrt(1.0 - tl * tl)
    cos_theta_m = tl * math.cos(margin) - sin_theta * math.sin(margin)
    ftl = jnp.where(tl > math.cos(math.pi - margin),
                    cos_theta_m, tl - math.sin(math.pi - margin) * margin)
    t_new = 0.01 * jnp.mean(tl) + 0.99 * jnp.asarray(t, jnp.float32)
    hard = cos_theta * (t_new + cos_theta)
    out = jnp.where(cos_theta > cos_theta_m, hard, cos_theta)
    out = out.at[jnp.arange(n), labels].set(ftl[:, 0])
    return out * s, t_new


def curricular_face_matched_ref(embeddings, weight, labels, t, *, margin=0.5, s=64.0,
                                mxu_dtype=jnp.bfloat16):
    """Module semantics with the kernel's exact numeric path (bf16 MXU operands,
    f32 target-logit pre-step, post-scale column normalization). Used to verify
    the Pallas implementation (tiling / gather / scatter / masking) tightly."""
    emb = embeddings.astype(jnp.float32)
    w = weight.astype(jnp.float32)
    emb_n = emb * jax.lax.rsqrt(jnp.sum(emb * emb, axis=1, keepdims=True))
    inv_wn = jax.lax.rsqrt(jnp.sum(w * w, axis=0, keepdims=True))
    lbl = labels.astype(jnp.int32)
    w_cols = jnp.take(w, lbl, axis=1).T
    inv_cols = jnp.take(inv_wn[0], lbl)
    tl = jnp.clip(jnp.sum(emb_n * w_cols, axis=1) * inv_cols, -1.0, 1.0)[:, None]
    sin_theta = jnp.sqrt(jnp.maximum(1.0 - tl * tl, 0.0))
    cos_theta_m = tl * math.cos(margin) - sin_theta * math.sin(margin)
    ftl = jnp.where(tl > math.cos(math.pi - margin),
                    cos_theta_m, tl - math.sin(math.pi - margin) * margin)
    t_new = 0.01 * jnp.mean(tl) + 0.99 * jnp.asarray(t, jnp.float32)
    ct = jnp.matmul(emb_n.astype(mxu_dtype).astype(jnp.float32),
                    w.astype(mxu_dtype).astype(jnp.float32),
                    precision=jax.lax.Precision.HIGHEST)
    ct = jnp.clip(ct * inv_wn, -1.0, 1.0)
    out = jnp.where(ct > cos_theta_m, ct * (t_new + ct), ct)
    col = jnp.arange(ct.shape[1], dtype=jnp.int32)[None, :]
    out = jnp.where(col == lbl[:, None], ftl, out)
    return out * s, t_new


if __name__ == "__main__":
    key = jax.random.PRNGKey(0)
    k1, k2, k3 = jax.random.split(key, 3)

    # Small CurricularFace-like shapes: batch=32, embedding_dim=64, classes=1024.
    N, D, C = 32, 64, 1024
    MARGIN, S = 0.5, 64.0

    embeddings = jax.random.normal(k1, (N, D), dtype=jnp.float32)
    weight = 0.01 * jax.random.normal(k2, (D, C), dtype=jnp.float32)   # init.normal_(std=0.01)
    labels = jax.random.randint(k3, (N,), 0, C, dtype=jnp.int32)
    t0 = jnp.float32(0.0)                                              # EMA buffer start

    # Small blocks so this tiny demo exercises a (2, 4) grid; production defaults
    # (block_n=256, block_c=1024) kick in for real shapes.
    out, t_new = curricular_face(embeddings, weight, labels, t0,
                                 margin=MARGIN, s=S, block_n=16, block_c=256)
    out = jax.block_until_ready(out)

    # 1) Tight check against a reference that mirrors the kernel's numeric path.
    m_out, m_t = curricular_face_matched_ref(embeddings, weight, labels, t0,
                                             margin=MARGIN, s=S)
    assert jnp.allclose(out, m_out, rtol=1e-4, atol=2e-3), \
        float(jnp.max(jnp.abs(out - m_out)))

    # 2) Strict f32 module reference: t_new must match tightly; the full output is
    #    checked loosely (bf16 MXU operands + rare mask-boundary sensitivity).
    ref_out, ref_t = curricular_face_ref(embeddings, weight, labels, t0,
                                         margin=MARGIN, s=S)
    assert jnp.allclose(t_new, ref_t, rtol=1e-5, atol=1e-5), (float(t_new), float(ref_t))
    frac_bad = jnp.mean((jnp.abs(out - ref_out) > 0.25).astype(jnp.float32))
    assert float(frac_bad) < 5e-3, float(frac_bad)

    print("KERNEL_OK")
</pallas_src>

<mosaic_0001>
module attributes {stable_mosaic.version = 11 : i64} {
  func.func @_curricular_fused_kernel(%arg0: i32, %arg1: i32, %arg2: memref<1x1xf32, #tpu.memory_space<smem>>, %arg3: memref<16x1xi32, #tpu.memory_space<vmem>>, %arg4: memref<16x1xf32, #tpu.memory_space<vmem>>, %arg5: memref<16x1xf32, #tpu.memory_space<vmem>>, %arg6: memref<16x64xbf16, #tpu.memory_space<vmem>>, %arg7: memref<64x256xbf16, #tpu.memory_space<vmem>>, %arg8: memref<1x256xf32, #tpu.memory_space<vmem>>, %arg9: memref<16x256xf32, #tpu.memory_space<vmem>>) attributes {dimension_semantics = [#tpu.dimension_semantics<parallel>, #tpu.dimension_semantics<parallel>], iteration_bounds = array<i64: 2, 4>, scalar_prefetch = 0 : i64, scratch_operands = 0 : i64, tpu.core_type = #tpu.core_type<tc>, window_params = [{transform_indices = @transform_0, window_bounds = array<i64: 1, 1>}, {transform_indices = @transform_1, window_bounds = array<i64: 16, 1>}, {transform_indices = @transform_2, window_bounds = array<i64: 16, 1>}, {transform_indices = @transform_3, window_bounds = array<i64: 16, 1>}, {transform_indices = @transform_4, window_bounds = array<i64: 16, 64>}, {transform_indices = @transform_5, window_bounds = array<i64: 64, 256>}, {transform_indices = @transform_6, window_bounds = array<i64: 1, 256>}, {transform_indices = @transform_7, window_bounds = array<i64: 16, 256>}]} {
    %c0 = arith.constant 0 : index
    %c0_0 = arith.constant 0 : index
    %0 = memref.load %arg2[%c0, %c0_0] : memref<1x1xf32, #tpu.memory_space<smem>>
    %c0_1 = arith.constant 0 : index
    %c0_2 = arith.constant 0 : index
    %1 = vector.load %arg6[%c0_1, %c0_2] : memref<16x64xbf16, #tpu.memory_space<vmem>>, vector<16x64xbf16>
    %c0_3 = arith.constant 0 : index
    %c0_4 = arith.constant 0 : index
    %2 = vector.load %arg7[%c0_3, %c0_4] : memref<64x256xbf16, #tpu.memory_space<vmem>>, vector<64x256xbf16>
    %cst = arith.constant dense<0.000000e+00> : vector<16x256xf32>
    %3 = tpu.matmul %1, %2, %cst {dimension_numbers = #tpu.dot_dimension_numbers<[1], [0], [0], [1], [0, 0, 1, 1], [], []>} : vector<16x64xbf16>, vector<64x256xbf16>, vector<16x256xf32> -> vector<16x256xf32>
    %c0_5 = arith.constant 0 : index
    %c0_6 = arith.constant 0 : index
    %4 = vector.load %arg8[%c0_5, %c0_6] : memref<1x256xf32, #tpu.memory_space<vmem>>, vector<1x256xf32>
    %5 = vector.broadcast %4 : vector<1x256xf32> to vector<16x256xf32>
    %6 = arith.mulf %3, %5 : vector<16x256xf32>
    %cst_7 = arith.constant -1.000000e+00 : f32
    %cst_8 = arith.constant 1.000000e+00 : f32
    %7 = vector.broadcast %cst_7 : f32 to vector<16x256xf32>
    %8 = arith.maximumf %7, %6 : vector<16x256xf32>
    %9 = vector.broadcast %cst_8 : f32 to vector<16x256xf32>
    %10 = arith.minimumf %9, %8 : vector<16x256xf32>
    %c0_9 = arith.constant 0 : index
    %c0_10 = arith.constant 0 : index
    %11 = vector.load %arg4[%c0_9, %c0_10] : memref<16x1xf32, #tpu.memory_space<vmem>>, vector<16x1xf32>
    %12 = vector.broadcast %11 : vector<16x1xf32> to vector<16x256xf32>
    %13 = arith.cmpf ogt, %10, %12 : vector<16x256xf32>
    %14 = vector.broadcast %0 : f32 to vector<16x256xf32>
    %15 = arith.addf %14, %10 : vector<16x256xf32>
    %16 = arith.mulf %10, %15 : vector<16x256xf32>
    %17 = arith.select %13, %16, %10 : vector<16x256xi1>, vector<16x256xf32>
    %18 = tpu.iota {dimensions = array<i32: 1>} : vector<16x256xi32>
    %c256_i32 = arith.constant 256 : i32
    %19 = arith.muli %arg1, %c256_i32 : i32
    %20 = vector.broadcast %19 : i32 to vector<16x256xi32>
    %21 = arith.addi %18, %20 : vector<16x256xi32>
    %c0_11 = arith.constant 0 : index
    %c0_12 = arith.constant 0 : index
    %22 = vector.load %arg3[%c0_11, %c0_12] : memref<16x1xi32, #tpu.memory_space<vmem>>, vector<16x1xi32>
    %23 = vector.broadcast %22 : vector<16x1xi32> to vector<16x256xi32>
    %24 = arith.cmpi eq, %21, %23 : vector<16x256xi32>
    %c0_13 = arith.constant 0 : index
    %c0_14 = arith.constant 0 : index
    %25 = vector.load %arg5[%c0_13, %c0_14] : memref<16x1xf32, #tpu.memory_space<vmem>>, vector<16x1xf32>
    %26 = vector.shape_cast %25 : vector<16x1xf32> to vector<16x1xf32>
    %27 = vector.broadcast %26 : vector<16x1xf32> to vector<16x256xf32>
    %28 = arith.select %24, %27, %17 : vector<16x256xi1>, vector<16x256xf32>
    %cst_15 = arith.constant 6.400000e+01 : f32
    %29 = vector.broadcast %cst_15 : f32 to vector<16x256xf32>
    %30 = arith.mulf %28, %29 : vector<16x256xf32>
    %c0_16 = arith.constant 0 : index
    %c0_17 = arith.constant 0 : index
    %31 = vector.load %arg9[%c0_16, %c0_17] : memref<16x256xf32, #tpu.memory_space<vmem>>, vector<16x256xf32>
    tpu.vector_store %arg9[%c0_16, %c0_17], %30 {strides = array<i32>} : memref<16x256xf32, #tpu.memory_space<vmem>>, vector<16x256xf32>,
    return
  }
  func.func @transform_0(%arg0: i32, %arg1: i32) -> (i32, i32) {
    %c0_i32 = arith.constant 0 : i32
    %c0_i32_0 = arith.constant 0 : i32
    %c0_i32_1 = arith.constant 0 : i32
    return %c0_i32, %c0_i32_0 : i32, i32
  }
  func.func @transform_1(%arg0: i32, %arg1: i32) -> (i32, i32) {
    %c0_i32 = arith.constant 0 : i32
    %c0_i32_0 = arith.constant 0 : i32
    return %arg0, %c0_i32 : i32, i32
  }
  func.func @transform_2(%arg0: i32, %arg1: i32) -> (i32, i32) {
    %c0_i32 = arith.constant 0 : i32
    %c0_i32_0 = arith.constant 0 : i32
    return %arg0, %c0_i32 : i32, i32
  }
  func.func @transform_3(%arg0: i32, %arg1: i32) -> (i32, i32) {
    %c0_i32 = arith.constant 0 : i32
    %c0_i32_0 = arith.constant 0 : i32
    return %arg0, %c0_i32 : i32, i32
  }
  func.func @transform_4(%arg0: i32, %arg1: i32) -> (i32, i32) {
    %c0_i32 = arith.constant 0 : i32
    %c0_i32_0 = arith.constant 0 : i32
    return %arg0, %c0_i32 : i32, i32
  }
  func.func @transform_5(%arg0: i32, %arg1: i32) -> (i32, i32) {
    %c0_i32 = arith.constant 0 : i32
    %c0_i32_0 = arith.constant 0 : i32
    return %c0_i32, %arg1 : i32, i32
  }
  func.func @transform_6(%arg0: i32, %arg1: i32) -> (i32, i32) {
    %c0_i32 = arith.constant 0 : i32
    %c0_i32_0 = arith.constant 0 : i32
    return %c0_i32, %arg1 : i32, i32
  }
  func.func @transform_7(%arg0: i32, %arg1: i32) -> (i32, i32) {
    %c0_i32 = arith.constant 0 : i32
    return %arg0, %arg1 : i32, i32
  }
}

</mosaic_0001>

<bundles_post_ra>
// kernel: tpu_custom_call.1
= control target key start
LH: loop header
LB: loop body
LE: loop exit
PB: predicated region body
PF: predicated region fallthrough
CT: control target
= control target key end

     0   :  { %s1418_s0 = inlined_call_operand.<no memory space> [shape: f32[1,1], index: 0, kind: input, shape index: {}]   ;;  %s1419_s1 = inlined_call_operand.vmem [shape: s32[32,1], index: 1, kind: input, shape index: {}]   ;;  %s1420_s2 = inlined_call_operand.vmem [shape: f32[32,1], index: 2, kind: input, shape index: {}]   ;;  %s1421_s3 = inlined_call_operand.vmem [shape: f32[32,1], index: 3, kind: input, shape index: {}]   ;;  %s1422_s4 = inlined_call_operand.vmem [shape: bf16[32,64], index: 4, kind: input, shape index: {}]   ;;  %s1423_s5 = inlined_call_operand.hbm [shape: bf16[64,1024], index: 5, kind: input, shape index: {}]   ;;  %s1424_s6 = inlined_call_operand.vmem [shape: f32[1,1024], index: 6, kind: input, shape index: {}]   ;;  %s1425_s7 = inlined_call_operand.hbm [shape: f32[32,1024], index: 7, kind: output, shape index: {}]  }
   0x1   :  { %12 = sst [smem:[#allocation2]] %s1418_s0 }
   0x2   :  { %13 = vsyncpa [#allocation4], 0 }
   0x3   :  { %15 = vsyncpa [#allocation4 + $0x1], 0 }
   0x4   :  { %16 = vsyncpa [#allocation5], 0 }
   0x5   :  { %18 = vsyncpa [#allocation5 + $0x1], 0  ;;  %s1156_s26 = smov 0   ;;  %s1158_s27 = smov 0  }
   0x6   :  { %s1160_s28 = smov 0   ;;  %s1162_s29 = smov 0  }
   0x7   :  { %s1164_s30 = smov 0   ;;  %s1166_s8 = smov 0  }
   0x8   :  { %s1168_s9 = smov 0   ;;  %s1170_s10 = smov 0  }
   0x9   :  { %s1172_s0 = smov 0   ;;  %s1174_s11 = smov 0  }
   0xa   :  { %s1176_s12 = smov 0  }
   0xb LB: > { %1431 = sst [smem:[#allocation9_spill]] %s1094_s0  ;;  %s783_s13 = sadd.s32 4294967295, %s1102_s12   ;;  %s1102_s12 = sphi %s1176_s12, %s24_s12   ;;  %s1098_s11 = sphi %s1174_s11, %s1445_s11   ;;  %s1094_s0 = sphi %s1172_s0, %s1444_s0   ;;  %s1090_s10 = sphi %s1170_s10, %s1443_s10   ;;  %s1086_s9 = sphi %s1168_s9, %s1442_s9   ;;  %s1082_s8 = sphi %s1166_s8, %s1451_s8   ;;  %s1078_s30 = sphi %s1164_s30, %s1450_s30   ;;  %s1074_s29 = sphi %s1162_s29, %s1449_s29   ;;  %s1070_s28 = sphi %s1160_s28, %s1448_s28   ;;  %s1066_s27 = sphi %s1158_s27, %s1447_s27   ;;  %s1062_s26 = sphi %s1156_s26, %s1446_s26  }
   0xc   : > { %1432 = sst [smem:[#allocation10_spill]] %s1098_s11  ;;  %s784_s14 = sadd.s32 4294967294, %s1102_s12  }
   0xd   : > { %s33_s15 = sadd.s32 1, %s1094_s0  ;;  %s36_s16 = sadd.s32 1, %s1098_s11 }
   0xe   : > { %p34_p0 = scmp.ge.s32.totalorder %s33_s15, 4  ;;  %s168_s17 = sadd.s32 1, %s1082_s8 }
   0xf   : > { %p175_p1 = scmp.ne.s32.totalorder %s1082_s8, %s1078_s30  ;;  %p176_p2 = scmp.eq.s32.totalorder %s1102_s12, 0 }
  0x10   : > { %s1453_s15 = smov (%p34_p0, %s33_s15), 0  ;;  %s1455_s16 = smov (!%p34_p0, %s36_s16), %s1098_s11 }
  0x11   : > { %1433 = sst [smem:[#allocation11_spill]] %s1453_s15  ;;  %s165_s18 = ssub.s32 %s1094_s0, %s1453_s15 }
  0x12   : > { %p1222_p3 = por %p176_p2, %p175_p1  ;;  %p38_p4 = scmp.ge.s32.totalorder %s1455_s16, 2 }
  0x13   : > { %p166_p5 = scmp.eq.s32.totalorder %s165_s18, 0  ;;  %p181_p6 = scmp.ne.s32.totalorder %s1078_s30, %s1074_s29 }
  0x14   : > { %p182_p7 = scmp.eq.s32.totalorder %s783_s13, 0  ;;  %s1457_s16 = smov (%p38_p4, %s1455_s16), 0 }
  0x15   : > { %1435 = sst [smem:[#allocation12_spill]] %s1457_s16  ;;  %s217_s22 = ssub.s32 %s1098_s11, %s1457_s16 }
  0x16   : > { %s1230_s20 = scalar_select %p166_p5, %s1082_s8, %s168_s17  }
  0x17   : > { %p1232_p8 = por %p182_p7, %p181_p6  ;;  %s219_s23 = sor.u32 %s217_s22, %s165_s18 }
  0x18   : > { %s222_s24 = sadd.s32 1, %s1070_s28  ;;  %p220_p9 = scmp.eq.s32.totalorder %s219_s23, 0 }
  0x19   : > { %p232_p10 = scmp.ne.s32.totalorder %s1070_s28, %s1066_s27  ;;  %p233_p11 = scmp.eq.s32.totalorder %s783_s13, 7 }
  0x1a   : > { %p238_p12 = scmp.ne.s32.totalorder %s1066_s27, %s1062_s26  ;;  %p239_p0 = scmp.eq.s32.totalorder %s784_s14, 7 }
  0x1b   : > { %s1244_s25 = scalar_select %p220_p9, %s1070_s28, %s222_s24  }
  0x1c   : > { %p1246_p13 = por %p233_p11, %p232_p10  ;;  %p838_p1 = scmp.lt.s32.totalorder %s1102_s12, 8 }
  0x1d   : > { %p1251_p2 = por %p239_p0, %p238_p12  ;;  %s298_s16 = sand.u32 1, %s1082_s8  }
  0x1e   : > { %s1437_s29 = scalar_select %p1246_p13, 1, 0 }
  0x1f   : > { %s1438_s17 = scalar_select %p1251_p2, 1, 0 }
  0x20   : > { %s787_s18 = sshll.u32 %s298_s16, 6  ;;  %s824_s22 = sshll.u32 %s1094_s0, 7 }
  0x21   : > { %s1260_s13 = scalar_lea.hbm %s1423_s5, %s824_s22  ;;  %s302_s24 = scalar_lea.vmem [#allocation3], %s787_s18 }
  0x22   : > { %s309_s11 = sshll.u32 %s302_s24, 4  ;;  %p1266_p4 = pnand %p838_p1, %p1222_p3  ;;  %s1262_s11 = int_to_ptr.vmem [resolvable:$true] %s309_s11 }
  0x23   : > { %s1270_s0 = scalar_lea.sflag [#allocation4], %s298_s16  ;;  %s950_s15 = scalar_lea.hbm %s1260_s13, 1024 }
  0x24   : > { %p951_p5 = scmp.ne.s32.totalorder %s1260_s13, %s950_s15  ;;  %p952_p6 = pneg %p1266_p4 }
  0x25   : > { %s955_s19 = scalar_lea.hbm %s1423_s5, 4096  ;;  %p956_p3 = scmp.lt.u32.totalorder %s1260_s13, %s1423_s5 }
  0x26   : > { %p953_p7 = pnand %p952_p6, %p951_p5  ;;  %p957_p10 = scmp.lt.u32.totalorder %s955_s19, %s950_s15 }
  0x27   : > { %p959_p12 = scmp.lt.u32.totalorder %s950_s15, %s1260_s13 }
  0x28   : > { %p954_p9 = pneg %p953_p7  ;;  %p958_p11 = por %p957_p10, %p956_p3 }
  0x2a   : > { %p960_p0 = por %p959_p12, %p958_p11 }
  0x2c   : > { %p961_p1 = pnand %p960_p0, %p954_p9 }
  0x2e   : > { %964 = shalt.err (!%p961_p1)
}
  0x2f   : > { %s965_s16 = scalar_lea.vmem %s1262_s11, 1024  ;;  %s1104_s18 = smov [#allocation3]  }
  0x30   : > { %p966_p5 = scmp.ne.s32.totalorder %s1262_s11, %s965_s16  ;;  %s970_s22 = sshll.u32 %s1104_s18, 4  ;;  %s971_s22 = int_to_ptr.vmem [resolvable:$false] %s970_s22 }
  0x31   : > { %s972_s23 = scalar_lea.vmem %s971_s22, 2048  ;;  %p973_p13 = scmp.lt.s32.totalorder %s1262_s11, %s971_s22 }
  0x32   : > { %p968_p7 = pnand %p966_p5, %p952_p6  ;;  %p974_p3 = scmp.lt.s32.totalorder %s972_s23, %s965_s16 }
  0x34   : > { %p969_p2 = pneg %p968_p7  ;;  %p975_p10 = por %p974_p3, %p973_p13 }
  0x36   : > { %p976_p11 = pnand %p975_p10, %p969_p2 }
  0x38   : > { %979 = shalt.err (!%p976_p11)
}
  0x39   : > { %s1105_s15 = smov 512   ;;  %s1106_s19 = smov 128  }
  0x3a   : > { %s1107_s24 = smov 8   ;;  %p790_p6 = scmp.ge.s32.totalorder %s1102_s12, 1 }
  0x3b   : > { %833 = dma.hbm_to_vmem [thread:$0]  (!%p1266_p4), %s1260_s13, 1024, %s1262_s11, %s1270_s0, %s1105_s15, %s1106_s19, %s1107_s24  }
  0x3c   : > { %p325_p9 = scmp.lt.s32.totalorder %s1102_s12, 9 }
  0x3e   : > { %p326_p12 = pnand %p790_p6, %p325_p9 }
  0x3f   : > { %s331_s16 = sand.u32 (!%p326_p12), 1, %s1078_s30  }
  0x40   : > { %329 = sbr.rel (%p326_p12) target bundleno = 333 (0x14d), region = 48  ;;  %s791_s18 = sshll.u32 (!%p326_p12), %s331_s16, 6 }
  0x41   : > { %s332_s22 = scalar_lea.sflag (!%p326_p12), [#allocation4], %s331_s16  ;;  %s1301_s23 = scalar_lea.vmem (!%p326_p12), [#allocation3], %s791_s18 }
  0x47   : > { %1053 = dma.done.wait (%p1232_p8), %s332_s22, 1024  }
  0x48   : > { %1055 = vsyncadd (%p1232_p8), %s332_s22, 4294966272  ;;  %s793_s0 = sshll.u32 %s1090_s10, 1  ;;  %v1108_v0 = vmov 0   ;;  %v937_v1 = vld [vmem:[%s1301_s23 + $0x4] ss:$8 sps:$4 sm:$0xff]   ;;  %vm479_vm0 = vcmask 523264   ;;  %v528_v16 = vlaneseq }
  0x49   : > { %515 = vmatprep.mubr.bf16.mxu0 %v1108_v0  ;;  %p391_p13 = scmp.lt.s32.totalorder %s793_s0, 3  ;;  %936 = vset.pattern.permute.xlu1 %v1108_v0  ;;  %v939_v2 = vld [vmem:[%s1301_s23] ss:$8 sps:$4 sm:$0xff]   ;;  %v940_v3 = vld [vmem:[%s1301_s23 + $0x14] ss:$8 sps:$4 sm:$0xff]   ;;  %s816_s18 = sshll.u32 %s1086_s9, 8 }
  0x4a   : > { %935 = vset.pattern.permute.xlu0 %v1108_v0  ;;  %483 = vmatprep.subr.bf16.mxu0 %v937_v1  ;;  %v942_v4 = vld [vmem:[%s1301_s23 + $0x10] ss:$8 sps:$4 sm:$0xff]   ;;  %v943_v5 = vld [vmem:[%s1301_s23 + $0x24] ss:$8 sps:$4 sm:$0xff]   ;;  %v945_v8 = vld [vmem:[%s1301_s23 + $0x20] ss:$8 sps:$4 sm:$0xff]   ;;  %v583_v27 = vstv %s816_s18 }
  0x4b   : > { %s1459_s0 = smov (!%p391_p13, %s793_s0), 3  ;;  %484 = vmatpush1.bf16.msra.mxu0 %v939_v2  ;;  %v946_v9 = vld [vmem:[%s1301_s23 + $0x34] ss:$8 sps:$4 sm:$0xff]   ;;  %v948_v12 = vld [vmem:[%s1301_s23 + $0x30] ss:$8 sps:$4 sm:$0xff]   ;;  %v529_v17 = vshrl.u32 %v528_v16, 7 }
  0x4c   : > { %s794_s11 = sshll.u32 %s1459_s0, 3  ;;  %s800_s13 = sshll.u32 %s1459_s0, 2  ;;  %485 = vmatprep.subr.bf16.mxu0 %v940_v3  ;;  %v580_v21 = vand.u32 127, %v528_v16 }
  0x4d   : > { %s394_s15 = scalar_lea.vmem %s1419_s1, %s794_s11  ;;  %s400_s16 = scalar_lea.vmem %s1420_s2, %s794_s11  ;;  %v530_v18 = vsub.s32 0, %v529_v17  ;;  %v534_v20 = vsub.s32 1, %v529_v17 }
  0x4e   : > { %s412_s0 = scalar_lea.vmem %s1422_s4, %s800_s13  ;;  %v586_v6 = vld [vmem:[%s394_s15] sm:$0xff]  ;;  %v587_v10 = vld [vmem:[%s394_s15 + $0x8] sm:$0xff]  ;;  %s406_s19 = scalar_lea.vmem %s1421_s3, %s794_s11  ;;  %v581_v26 = vadd.s32 128, %v580_v21  ;;  %v584_v34 = vadd.s32 %v583_v27, %v580_v21 }
  0x4f   : > { %v550_v7 = vld [vmem:[%s400_s16] sm:$0xff]  ;;  %486 = vmatpush1.bf16.msra.mxu0 %v942_v4  ;;  %589 = vperm.xlu1 %936, %v586_v6   ;;  %v551_v11 = vld [vmem:[%s400_s16 + $0x8] sm:$0xff]  ;;  %s1329_s13 = sshll.u32 %s1086_s9, 1  ;;  %s423_s16 = sld [smem:[#allocation2]] }
  0x50   : > { %487 = vmatprep.subr.bf16.mxu0 %v943_v5  ;;  %554 = vperm.xlu0 %935, %v550_v7   ;;  %v599_v13 = vld [vmem:[%s406_s19 + $0x8] sm:$0xff]  ;;  %v598_v14 = vld [vmem:[%s406_s19] sm:$0xff]  ;;  %p416_p8 = scmp.lt.s32.totalorder %s1329_s13, 7  ;;  %s825_s9 = sshll.u32 %s1090_s10, 4  ;;  %v585_v39 = vadd.s32 %v583_v27, %v581_v26 }
  0x51   : > { %v949_v15 = vld [vmem:[%s412_s0] sm:$0xff]   ;;  %s387_s22 = sand.u32 1, %s1066_s27   ;;  %s1340_s0 = sadd.s32 %s825_s9, %s1329_s13 }
  0x52   : > { %s417_s11 = scalar_select %p416_p8, %s1329_s13, 7 }
  0x53   : > { %488 = vmatpush1.bf16.msra.mxu0 %v945_v8  ;;  %592 = vperm.xlu1 %936, %v587_v10   ;;  %s792_s21 = sshll.u32 %s387_s22, 5  ;;  %s821_s10 = sshll.u32 %s1340_s0, 7 }
  0x54   : > { %489 = vmatprep.subr.bf16.mxu0 %v946_v9  ;;  %559 = vperm.xlu0 %935, %v551_v11   ;;  %s418_s24 = scalar_lea.vmem %s1424_s6, %s417_s11  ;;  %s389_s14 = scalar_lea.vmem [#allocation6], %s792_s21 }
  0x55   : > { %v526_v19 = vld [vmem:[%s418_s24] sm:$0x3]  ;;  %v566_v31 = vstv %s423_s16  ;;  %s639_s19 = sshll.u32 %s389_s14, 4  ;;  %s1350_s23 = scalar_lea.hbm %s1425_s7, %s821_s10  ;;  %s1353_s19 = int_to_ptr.vmem [resolvable:$true] %s639_s19 }
  0x56   : > { %v531_v23 = vrot.slane %v526_v19, %v530_v18  ;;  %v535_v24 = vrot.slane %v526_v19, %v534_v20  ;;  %s1357_s15 = scalar_lea.sflag [#allocation5], %s387_s22  ;;  %s980_s24 = scalar_lea.vmem %s1353_s19, 512 }
  0x57   : > { %490 = vmatpush1.bf16.msra.mxu0 %v948_v12  ;;  %607 = vperm.xlu1 %936, %v599_v13   ;;  %p981_p2 = scmp.ne.s32.totalorder %s1353_s19, %s980_s24  ;;  %p1440_p4 = scmp.ne.s32.totalorder %s1437_s29, 0 }
  0x58   : > { %602 = vperm.xlu0 %935, %v598_v14   ;;  %s1109_s16 = smov [#allocation6]  }
  0x59   : > { %p982_p0 = pnand %p981_p2, %p1440_p4  ;;  %s984_s18 = sshll.u32 %s1109_s16, 4  ;;  %s985_s18 = int_to_ptr.vmem [resolvable:$false] %s984_s18 }
  0x5a   : > { %811 = vmatmul.mubr.msk.bf16.vlgmr.msra.gmra.mrb[0].mxu0 %vm479_vm0, %v949_v15  ;;  %s986_s9 = scalar_lea.vmem %s985_s18, 1024  ;;  %p987_p5 = scmp.lt.s32.totalorder %s1353_s19, %s985_s18 }
  0x5b   : > { %p983_p1 = pneg %p982_p0  ;;  %p988_p7 = scmp.lt.s32.totalorder %s986_s9, %s980_s24 }
  0x5d   : > { %p989_p3 = por %p988_p7, %p987_p5 }
  0x5f   : > { %p990_p10 = pnand %p989_p3, %p983_p1 }
  0xce   : > { %v590_v25 = vpop.permute.xlu1 %589 }
  0xcf   : > { %v555_v22 = vpop.permute.xlu0 %554  ;;  %vm594_vm1 = vcmp.eq.s32.totalorder %v584_v34, %v590_v25  ;;  %vm595_vm2 = vcmp.eq.s32.totalorder %v585_v39, %v590_v25 }
  0xd2   : > { %v593_v42 = vpop.permute.xlu1 %592 }
  0xd3   : > { %v560_v35 = vpop.permute.xlu0 %559  ;;  %vm596_vm4 = vcmp.eq.s32.totalorder %v584_v34, %v593_v42  ;;  %vm597_vm8 = vcmp.eq.s32.totalorder %v585_v39, %v593_v42 }
  0xd6   : > { %v608_v57 = vpop.permute.xlu1 %607 }
  0xd7   : > { %v603_v52 = vpop.permute.xlu0 %602 }
 0x12d   : > { %v517_v28 = vpop.f32.mrb[0].mxu0 }
 0x12e   : > { %v538_v29 = vmul.f32 %v531_v23, %v517_v28  ;;  %v519_v30 = vpop.f32.mrb[1].mxu0 }
 0x12f   : > { %v539_v32 = vmul.f32 %v535_v24, %v519_v30  ;;  %v521_v33 = vpop.f32.mrb[2].mxu0 }
 0x130   : > { %v812_v36 = vclamps-f32 %v538_v29, 1.0  ;;  %v540_v37 = vmul.f32 %v531_v23, %v521_v33  ;;  %v523_v38 = vpop.f32.mrb[3].mxu0 }
 0x131   : > { %v813_v40 = vclamps-f32 %v539_v32, 1.0  ;;  %v541_v41 = vmul.f32 %v535_v24, %v523_v38 }
 0x132   : > { %v567_v43 = vadd.f32 %v812_v36, %v566_v31  ;;  %v814_v44 = vclamps-f32 %v540_v37, 1.0  ;;  %vm562_vm3 = vcmp.gt.f32.partialorder %v812_v36, %v555_v22 }
 0x133   : > { %v568_v45 = vadd.f32 %v813_v40, %v566_v31  ;;  %v815_v46 = vclamps-f32 %v541_v41, 1.0  ;;  %vm563_vm5 = vcmp.gt.f32.partialorder %v813_v40, %v555_v22 }
 0x134   : > { %v569_v47 = vadd.f32 %v814_v44, %v566_v31  ;;  %v571_v48 = vmul.f32 %v812_v36, %v567_v43  ;;  %vm564_vm6 = vcmp.gt.f32.partialorder %v814_v44, %v560_v35 }
 0x135   : > { %v570_v49 = vadd.f32 %v815_v46, %v566_v31  ;;  %v572_v50 = vmul.f32 %v813_v40, %v568_v45  ;;  %vm565_vm7 = vcmp.gt.f32.partialorder %v815_v46, %v560_v35 }
 0x136   : > { %v573_v51 = vmul.f32 %v814_v44, %v569_v47  ;;  %v575_v53 = vsel %vm562_vm3, %v571_v48, %v812_v36 }
 0x137   : > { %v574_v54 = vmul.f32 %v815_v46, %v570_v49  ;;  %v576_v55 = vsel %vm563_vm5, %v572_v50, %v813_v40  ;;  %v610_v56 = vsel %vm594_vm1, %v603_v52, %v575_v53 }
 0x138   : > { %v577_v58 = vsel %vm564_vm6, %v573_v51, %v814_v44  ;;  %v611_v59 = vsel %vm595_vm2, %v603_v52, %v576_v55  ;;  %v614_v60 = vmul.f32 64.0, %v610_v56 }
 0x139   : > { %v578_v61 = vsel %vm565_vm7, %v574_v54, %v815_v46  ;;  %v612_v62 = vsel %vm596_vm4, %v608_v57, %v577_v58  ;;  %v615_v63 = vmul.f32 64.0, %v611_v59 }
 0x13a   : > { %v613_v0 = vsel %vm597_vm8, %v608_v57, %v578_v61  ;;  %v616_v1 = vmul.f32 64.0, %v612_v62  ;;  %618 = vst [vmem:[%s389_s14] sm:$0xff] %v614_v60 }
 0x13b   : > { %v617_v2 = vmul.f32 64.0, %v613_v0  ;;  %619 = vst [vmem:[%s389_s14 + $0x8] sm:$0xff] %v615_v63 }
 0x13c   : > { %620 = vst [vmem:[%s389_s14 + $0x10] sm:$0xff] %v616_v1 }
 0x13d   : > { %621 = vst [vmem:[%s389_s14 + $0x18] sm:$0xff] %v617_v2 }
 0x13e   : > { %993 = shalt.err (!%p990_p10)
}
 0x13f   : > { %s994_s22 = scalar_lea.hbm %s1350_s23, 512  ;;  %s998_s10 = scalar_lea.hbm %s1425_s7, 4096 }
 0x140   : > { %p995_p11 = scmp.ne.s32.totalorder %s1350_s23, %s994_s22  ;;  %p999_p12 = scmp.lt.u32.totalorder %s1350_s23, %s1425_s7 }
 0x141   : > { %p1000_p13 = scmp.lt.u32.totalorder %s998_s10, %s994_s22  ;;  %p1002_p2 = scmp.lt.u32.totalorder %s994_s22, %s1350_s23 }
 0x142   : > { %p996_p6 = pnand %p995_p11, %p1440_p4 }
 0x143   : > { %p1001_p8 = por %p1000_p13, %p999_p12 }
 0x144   : > { %p997_p9 = pneg %p996_p6 }
 0x145   : > { %p1003_p0 = por %p1002_p2, %p1001_p8 }
 0x147   : > { %p1004_p1 = pnand %p1003_p0, %p997_p9 }
 0x149   : > { %1007 = shalt.err (!%p1004_p1)
}
 0x14a   : > { %s1110_s11 = smov 256   ;;  %s1111_s24 = smov 1024  }
 0x14b   : > { %s1112_s16 = smov 16  }
 0x14c   : > { %828 = dma.vmem_to_hbm [thread:$0]  (%p1440_p4), %s1353_s19, 512, %s1350_s23, %s1357_s15, %s1110_s11, %s1111_s24, %s1112_s16  }
 0x14d PF: > { %p839_p5 = scmp.ge.s32.totalorder %s1102_s12, 2  ;;  %s654_s18 = sand.u32 1, %s1062_s26  }
 0x14e   : > { %p1441_p7 = scmp.ne.s32.totalorder %s1438_s17, 0  ;;  %s655_s9 = scalar_lea.sflag [#allocation5], %s654_s18 }
 0x150   : > { %p835_p3 = pnand %p839_p5, %p1441_p7 }
 0x152   : > { %1057 = dma.done.wait (!%p835_p3), %s655_s9, 512  }
 0x153   : > { %1059 = vsyncadd (!%p835_p3), %s655_s9, 4294966784  ;;  %s24_s12 = sadd.s32 1, %s1102_s12   ;;  %s1442_s9 = sld [smem:[#allocation9_spill]] }
 0x154   : > { %p21_p10 = scmp.ge.s32.totalorder %s24_s12, 10   ;;  %s1443_s10 = sld [smem:[#allocation10_spill]] }
 0x155   : > { %s1444_s0 = sld [smem:[#allocation11_spill]]  ;;  %s1445_s11 = sld [smem:[#allocation12_spill]] }
 0x156   : > { %s1446_s26 = smov %s1066_s27  ;;  %s1447_s27 = smov %s1070_s28 }
 0x157   : > { %s1448_s28 = smov %s1244_s25  ;;  %s1449_s29 = smov %s1078_s30 }
 0x158   : > { %s1450_s30 = smov %s1082_s8  ;;  %s1451_s8 = smov %s1230_s20 }
 0x159   :  { %23 = sbr.rel (!%p21_p10) target bundleno = 11 (0xb), region = 108 }
 0x160   :  { %660 = vsyncpa [#allocation4], 1 }
 0x161   :  { %662 = vsyncpa [#allocation4 + $0x1], 1 }
 0x162   :  { %663 = vsyncpa [#allocation5], 1 }
 0x163   :  { %665 = vsyncpa [#allocation5 + $0x1], 1 }

</bundles_post_ra>
